<compile_context>
chip_gen: v7x
topology: tpu7x:2x2x1
jax: 0.10.0
libtpu: 0.0.40
codegen_flags: <defaults>
</compile_context>

<pallas_src>
import functools

import jax
import jax.numpy as jnp
from jax.experimental import pallas as pl
from jax.experimental.pallas import tpu as pltpu


_SMALL_BLOCK_BYTES = 1 << 20      # Path-A threshold (conservatively padded VMEM footprint)
_DEFAULT_BLOCK_BYTES = 2 << 20    # ~2 MiB streaming blocks (~85% of HBM roofline; bigger ~ no gain)


def _trapezoid_kernel(x_ref, o_ref, *, a, b, c, d, inv_ba, inv_dc,
                      do_incr, do_plateau, do_decr, compute_dtype):
    """Elementwise trapezoidal membership on one VMEM tile.

    Closed form: y = clamp(min(up, down), 0, 1), with static guards so the degenerate cases
    (a==b, b==c, c==d) reproduce the PyTorch masked-assignment semantics exactly:
        if a < b: yvals[(a < x) & (x <= b)] = (x - a) / (b - a)
        if b < c: yvals[(b < x) & (x <= c)] = 1
        if c < d: yvals[(c <= x) & (x < d)] = (d - x) / (d - c)
    """
    if not (do_incr or do_plateau or do_decr):
        # a == b == c == d: every PyTorch branch is skipped -> membership is identically 0.
        o_ref[...] = jnp.zeros(o_ref.shape, o_ref.dtype)
        return

    x = x_ref[...].astype(compute_dtype)
    one = jnp.ones((), compute_dtype)
    zero = jnp.zeros((), compute_dtype)

    if do_incr:                       # a < b : rising ramp (x - a) / (b - a)
        up = (x - a) * inv_ba
    elif do_plateau:                  # a == b < c : plateau needs b < x (strict)
        up = jnp.where(x > a, one, zero)
    else:                             # a == b == c < d : decr branch is inclusive at x == c
        up = jnp.where(x >= a, one, zero)

    if do_decr:                       # c < d : falling ramp (d - x) / (d - c)
        down = (d - x) * inv_dc
    else:                             # c == d : covered region ends at x <= c (inclusive)
        down = jnp.where(x <= c, one, zero)

    y = jnp.maximum(zero, jnp.minimum(one, jnp.minimum(up, down)))
    o_ref[...] = y.astype(o_ref.dtype)


def _round_up(v, m):
    return -(-v // m) * m


def _padded_vmem_bytes(shape, itemsize):
    """Conservative VMEM footprint of the whole array after (8, 128) layout padding."""
    if len(shape) == 0:
        return 8 * 128 * itemsize
    if len(shape) == 1:
        return 8 * _round_up(shape[0], 128) * itemsize
    lead = 1
    for s in shape[:-2]:
        lead *= s
    return lead * _round_up(shape[-2], 8) * _round_up(shape[-1], 128) * itemsize


def _stream_2d(x2, kernel, row_tile, lane, rows, out_dtype, itemsize, core_parallel):
    """Stream a (rows, lane) slab through the kernel in contiguous (row_tile, lane) blocks."""
    grid = (pl.cdiv(rows, row_tile),)   # partial last block: Pallas read-pads / masks the write
    # "parallel" vs "arbitrary" has near-zero codegen impact and does NOT split across v7x's
    # two TensorCores; CORE_PARALLEL does (use core_parallel=True on v7x). No-op on v5e/v6e.
    sems = (pltpu.CORE_PARALLEL,) if core_parallel else ("parallel",)
    cp_kwargs = {"dimension_semantics": sems}
    live_bytes = 4 * row_tile * lane * itemsize   # in + out, double-buffered
    if live_bytes > (12 << 20):                   # keep headroom under v5e's 16 MiB scoped default
        cp_kwargs["vmem_limit_bytes"] = int(min(live_bytes + (4 << 20), 100 << 20))
    return pl.pallas_call(
        kernel,
        out_shape=jax.ShapeDtypeStruct((rows, lane), out_dtype),
        grid=grid,
        in_specs=[pl.BlockSpec((row_tile, lane), lambda i: (i, 0))],
        out_specs=pl.BlockSpec((row_tile, lane), lambda i: (i, 0)),
        compiler_params=pltpu.CompilerParams(**cp_kwargs),
    )(x2)


def trapezoidal_membfunc(x, a, b, c, d, *,
                         target_block_bytes=_DEFAULT_BLOCK_BYTES,
                         core_parallel=False):
    """Apply the trapezoidal membership function elementwise to x via Pallas.

    a, b, c, d must satisfy a <= b <= c <= d and are static Python floats (mirroring the
    PyTorch module's scalar parameters at forward time).
    """
    a, b, c, d = float(a), float(b), float(c), float(d)
    assert a <= b <= c <= d, "Trapezoidal parameters: must have a <= b <= c <= d."
    assert jnp.issubdtype(x.dtype, jnp.floating), (
        "TrapezoidalMembFunc expects a floating-point input (memberships are in [0, 1]).")

    orig_shape = x.shape
    out_dtype = x.dtype
    itemsize = x.dtype.itemsize
    n = x.size

    # bf16 stays bf16 on-chip (halves HBM traffic & VALU work on v6e/v7x); others compute in f32.
    compute_dtype = x.dtype if x.dtype in (jnp.float32, jnp.bfloat16) else jnp.float32

    kernel = functools.partial(
        _trapezoid_kernel,
        a=a, b=b, c=c, d=d,
        inv_ba=(1.0 / (b - a) if a < b else 0.0),
        inv_dc=(1.0 / (d - c) if c < d else 0.0),
        do_incr=bool(a < b), do_plateau=bool(b < c), do_decr=bool(c < d),
        compute_dtype=compute_dtype,
    )

    if n == 0:
        return jnp.zeros(orig_shape, out_dtype)
    if x.ndim == 0:
        x = x.reshape(1, 1)

    # --- Path A: small input -> one whole-array block (no reshape / pad / slice copies). ---
    if _padded_vmem_bytes(x.shape, itemsize) <= _SMALL_BLOCK_BYTES:
        out = pl.pallas_call(
            kernel,
            out_shape=jax.ShapeDtypeStruct(x.shape, out_dtype),
        )(x)
        return out.reshape(orig_shape)

    # --- Path B: last dim is already lane-aligned -> collapse leading dims, stream. ---
    if x.ndim >= 2 and x.shape[-1] % 128 == 0:
        lane = x.shape[-1]
        rows = n // lane
        x2 = x.reshape(rows, lane)   # collapses leading dims only; minor dim unchanged
        rows_cap = max(8, (target_block_bytes // (lane * itemsize)) // 8 * 8)
        row_tile = rows if rows <= rows_cap else rows_cap
        out = _stream_2d(x2, kernel, row_tile, lane, rows, out_dtype, itemsize, core_parallel)
        return out.reshape(orig_shape)

    # --- Path C (rare fallback: large AND unaligned last dim): flatten + pad to 128 lanes. ---
    # This path pays extra HBM round trips for the pad/reshape/slice; only hit when the input
    # is both too big for a single block and has a last dim that is not a multiple of 128.
    lane = 128
    flat = x.reshape(-1)
    pad = (-n) % lane
    if pad:
        flat = jnp.pad(flat, (0, pad))
    rows = flat.size // lane
    x2 = flat.reshape(rows, lane)
    rows_cap = max(8, (target_block_bytes // (lane * itemsize)) // 8 * 8)
    row_tile = rows if rows <= rows_cap else rows_cap
    out = _stream_2d(x2, kernel, row_tile, lane, rows, out_dtype, itemsize, core_parallel)
    out_flat = out.reshape(-1)
    if out_flat.size != n:
        out_flat = out_flat[:n]
    return out_flat.reshape(orig_shape)


def _reference(x, a, b, c, d):
    """Pure-JAX reference mirroring the PyTorch forward (with true divisions)."""
    xf = x.astype(jnp.float32)
    y = jnp.zeros_like(xf)
    if a < b:
        y = jnp.where((a < xf) & (xf <= b), (xf - a) / (b - a), y)
    if b < c:
        y = jnp.where((b < xf) & (xf <= c), 1.0, y)
    if c < d:
        y = jnp.where((c <= xf) & (xf < d), (d - xf) / (d - c), y)
    return y.astype(x.dtype)


if __name__ == "__main__":
    a, b, c, d = 0.2, 0.4, 0.6, 0.8
    key = jax.random.PRNGKey(0)
    k0, k1, k2 = jax.random.split(key, 3)

    # 1) Small NCHW input -> Path A (single whole-array block, zero wrapper copies).
    x = jax.random.uniform(k0, (2, 4, 16, 16), dtype=jnp.float32, minval=-0.2, maxval=1.2)
    y = jax.block_until_ready(trapezoidal_membfunc(x, a, b, c, d))
    assert y.shape == x.shape and y.dtype == x.dtype
    assert jnp.allclose(y, _reference(x, a, b, c, d), atol=1e-6, rtol=1e-5), "mismatch (small)"

    # Degenerate parameter cases on the same small input: rectangle (a==b, c==d), triangle (b==c).
    y_rect = jax.block_until_ready(trapezoidal_membfunc(x, 0.3, 0.3, 0.7, 0.7))
    assert jnp.allclose(y_rect, _reference(x, 0.3, 0.3, 0.7, 0.7), atol=1e-6, rtol=1e-5), \
        "mismatch (rectangle)"
    y_tri = jax.block_until_ready(trapezoidal_membfunc(x, 0.2, 0.5, 0.5, 0.8))
    assert jnp.allclose(y_tri, _reference(x, 0.2, 0.5, 0.5, 0.8), atol=1e-6, rtol=1e-5), \
        "mismatch (triangle)"

    # 2) Lane-aligned input -> Path B streaming: multi-step grid including a partial last block
    #    (rows = 16*7*33 = 3696, row_tile = 256 -> 15 steps, last one ragged), no padding/slicing.
    x_big = jax.random.uniform(k1, (16, 7, 33, 128), dtype=jnp.float32, minval=-0.2, maxval=1.2)
    y_big = jax.block_until_ready(
        trapezoidal_membfunc(x_big, a, b, c, d, target_block_bytes=128 * 1024))
    assert jnp.allclose(y_big, _reference(x_big, a, b, c, d), atol=1e-6, rtol=1e-5), \
        "mismatch (streaming / partial block)"

    # 3) bf16 input with an unaligned last dim, too big for one block -> Path C fallback,
    #    with the elementwise math kept in bf16 on-chip.
    x_bf = jax.random.uniform(k2, (8, 600, 200), minval=-0.2, maxval=1.2).astype(jnp.bfloat16)
    y_bf = jax.block_until_ready(trapezoidal_membfunc(x_bf, a, b, c, d))
    assert y_bf.dtype == jnp.bfloat16
    assert jnp.allclose(y_bf.astype(jnp.float32),
                        _reference(x_bf, a, b, c, d).astype(jnp.float32),
                        atol=2e-2, rtol=2e-2), "mismatch (bf16 fallback)"

    print("KERNEL_OK")
</pallas_src>

<mosaic_0001>
module attributes {stable_mosaic.version = 11 : i64} {
  func.func @_trapezoid_kernel(%arg0: memref<2x4x16x16xf32, #tpu.memory_space<vmem>>, %arg1: memref<2x4x16x16xf32, #tpu.memory_space<vmem>>) attributes {dimension_semantics = [], scalar_prefetch = 0 : i64, scratch_operands = 0 : i64, tpu.core_type = #tpu.core_type<tc>} {
    %c0 = arith.constant 0 : index
    %c0_0 = arith.constant 0 : index
    %c0_1 = arith.constant 0 : index
    %c0_2 = arith.constant 0 : index
    %0 = vector.load %arg0[%c0, %c0_0, %c0_1, %c0_2] : memref<2x4x16x16xf32, #tpu.memory_space<vmem>>, vector<2x4x16x16xf32>
    %cst = arith.constant 2.000000e-01 : f32
    %1 = vector.broadcast %cst : f32 to vector<2x4x16x16xf32>
    %2 = arith.subf %0, %1 : vector<2x4x16x16xf32>
    %cst_3 = arith.constant 5.000000e+00 : f32
    %3 = vector.broadcast %cst_3 : f32 to vector<2x4x16x16xf32>
    %4 = arith.mulf %2, %3 : vector<2x4x16x16xf32>
    %cst_4 = arith.constant 8.000000e-01 : f32
    %5 = vector.broadcast %cst_4 : f32 to vector<2x4x16x16xf32>
    %6 = arith.subf %5, %0 : vector<2x4x16x16xf32>
    %cst_5 = arith.constant 5.000000e+00 : f32
    %7 = vector.broadcast %cst_5 : f32 to vector<2x4x16x16xf32>
    %8 = arith.mulf %6, %7 : vector<2x4x16x16xf32>
    %9 = arith.minimumf %4, %8 : vector<2x4x16x16xf32>
    %cst_6 = arith.constant 1.000000e+00 : f32
    %10 = vector.broadcast %cst_6 : f32 to vector<2x4x16x16xf32>
    %11 = arith.minimumf %10, %9 : vector<2x4x16x16xf32>
    %cst_7 = arith.constant 0.000000e+00 : f32
    %12 = vector.broadcast %cst_7 : f32 to vector<2x4x16x16xf32>
    %13 = arith.maximumf %12, %11 : vector<2x4x16x16xf32>
    %c0_8 = arith.constant 0 : index
    %c0_9 = arith.constant 0 : index
    %c0_10 = arith.constant 0 : index
    %c0_11 = arith.constant 0 : index
    %14 = vector.load %arg1[%c0_8, %c0_9, %c0_10, %c0_11] : memref<2x4x16x16xf32, #tpu.memory_space<vmem>>, vector<2x4x16x16xf32>
    tpu.vector_store %arg1[%c0_8, %c0_9, %c0_10, %c0_11], %13 {strides = array<i32>} : memref<2x4x16x16xf32, #tpu.memory_space<vmem>>, vector<2x4x16x16xf32>,
    return
  }
}

</mosaic_0001>

<bundles_post_ra>
// kernel: tpu_custom_call.1
= control target key start
LH: loop header
LB: loop body
LE: loop exit
PB: predicated region body
PF: predicated region fallthrough
CT: control target
= control target key end

     0   :  { %6 = vsyncpa [#allocation3], 0  ;;  %s313_s0 = inlined_call_operand.hbm [shape: f32[2,4,16,16], index: 0, kind: input, shape index: {}]   ;;  %s314_s1 = inlined_call_operand.hbm [shape: f32[2,4,16,16], index: 1, kind: output, shape index: {}]  }
   0x1   :  { %7 = vsyncpa [#allocation4], 0  ;;  %s253_s6 = smov [#allocation2]   ;;  %s205_s10 = scalar_lea.hbm %s313_s0, 2048 }
   0x2   :  { %s13_s7 = sshll.u32 %s253_s6, 4  ;;  %p206_p0 = scmp.ne.s32.totalorder %s313_s0, %s205_s10  ;;  %s14_s7 = int_to_ptr.vmem [resolvable:$true] %s13_s7 }
   0x3   :  { %p209_p1 = scmp.lt.u32.totalorder %s205_s10, %s313_s0 }
   0x5   :  { %p211_p2 = pnand %p209_p1, %p206_p0 }
   0x7   :  { %214 = shalt.err (!%p211_p2)
}
   0x8   :  { %s215_s15 = scalar_lea.vmem %s14_s7, 2048  ;;  %p220_p4 = scmp.lt.s32.totalorder %s14_s7, %s14_s7 }
   0x9   :  { %p216_p3 = scmp.ne.s32.totalorder %s14_s7, %s215_s15  ;;  %p221_p5 = scmp.lt.s32.totalorder %s215_s15, %s215_s15 }
   0xb   :  { %p222_p6 = por %p221_p5, %p220_p4 }
   0xd   :  { %p223_p7 = pnand %p222_p6, %p216_p3 }
   0xf   :  { %226 = shalt.err (!%p223_p7)
}
  0x10   :  { %s254_s16 = smov 128   ;;  %s255_s17 = smov 8  }
  0x11   :  { %19 = dma.hbm_to_vmem [thread:$0]  %s313_s0, 2048, %s14_s7, [#allocation3], %s254_s16, %s254_s16, %s255_s17  }
  0x12   :  { %249 = dma.done.wait [#allocation3], 2048  }
  0x13   :  { %250 = vsyncadd [#allocation3], 4294965248  ;;  %v23_v0 = vld [vmem:[#allocation2] sm:$0xff]  ;;  %vm151_vm0 = vcmask 130048   ;;  %v24_v1 = vld [vmem:[#allocation2 + $0x8] sm:$0xff]  ;;  %s256_s0 = smov [#allocation5]  }
  0x14   :  { %v25_v2 = vld [vmem:[#allocation2 + $0x10] sm:$0xff]  ;;  %v185_v3 = vadd.f32 -0.2, %v23_v0  ;;  %v71_v4 = vsub.f32 0.8, %v23_v0  ;;  %v26_v12 = vld [vmem:[#allocation2 + $0x18] sm:$0xff] }
  0x15   :  { %v186_v5 = vadd.f32 -0.2, %v24_v1  ;;  %v72_v6 = vsub.f32 0.8, %v24_v1  ;;  %v187_v7 = vadd.f32 -0.2, %v25_v2 }
  0x16   :  { %v73_v8 = vsub.f32 0.8, %v25_v2  ;;  %v55_v9 = vmul.f32 5.0, %v185_v3  ;;  %v87_v10 = vmul.f32 5.0, %v71_v4  ;;  %v27_v13 = vld [vmem:[#allocation2 + $0x20] sm:$0xff]  ;;  %v28_v14 = vld [vmem:[#allocation2 + $0x28] sm:$0xff] }
  0x17   :  { %v56_v11 = vmul.f32 5.0, %v186_v5  ;;  %v88_v15 = vmul.f32 5.0, %v72_v6  ;;  %v57_v16 = vmul.f32 5.0, %v187_v7  ;;  %v188_v18 = vadd.f32 -0.2, %v26_v12  ;;  %v29_v27 = vld [vmem:[#allocation2 + $0x30] sm:$0xff] }
  0x18   :  { %v89_v17 = vmul.f32 5.0, %v73_v8  ;;  %v103_v19 = vmin.f32 %v55_v9, %v87_v10  ;;  %v74_v20 = vsub.f32 0.8, %v26_v12  ;;  %v189_v21 = vadd.f32 -0.2, %v27_v13  ;;  %v30_v36 = vld [vmem:[#allocation2 + $0x38] sm:$0xff] }
  0x19   :  { %v75_v22 = vsub.f32 0.8, %v27_v13  ;;  %v104_v23 = vmin.f32 %v56_v11, %v88_v15  ;;  %v58_v25 = vmul.f32 5.0, %v188_v18  ;;  %v190_v26 = vadd.f32 -0.2, %v28_v14  ;;  %v31_v41 = vld [vmem:[#allocation2 + $0x40] sm:$0xff] }
  0x1a   :  { %v105_v24 = vmin.f32 %v57_v16, %v89_v17  ;;  %v119_v28 = vmin.f32 %v103_v19, 1.0  ;;  %v90_v29 = vmul.f32 5.0, %v74_v20  ;;  %v59_v30 = vmul.f32 5.0, %v189_v21  ;;  %v32_v54 = vld [vmem:[#allocation2 + $0x48] sm:$0xff]  ;;  %v33_v59 = vld [vmem:[#allocation2 + $0x50] sm:$0xff]  ;;  %v34_v3 = vld [vmem:[#allocation2 + $0x58] sm:$0xff] }
  0x1b   :  { %v91_v31 = vmul.f32 5.0, %v75_v22  ;;  %v120_v32 = vmin.f32 %v104_v23, 1.0  ;;  %v60_v34 = vmul.f32 5.0, %v190_v26  ;;  %v76_v35 = vsub.f32 0.8, %v28_v14  ;;  %v35_v12 = vld [vmem:[#allocation2 + $0x60] sm:$0xff] }
  0x1c   :  { %v121_v33 = vmin.f32 %v105_v24, 1.0  ;;  %v135_v37 = vmax.f32 %v119_v28, 0.0  ;;  %v106_v38 = vmin.f32 %v58_v25, %v90_v29  ;;  %v191_v40 = vadd.f32 -0.2, %v29_v27  ;;  %v36_v21 = vld [vmem:[#allocation2 + $0x68] sm:$0xff]  ;;  %v37_v22 = vld [vmem:[#allocation2 + $0x70] sm:$0xff] }
  0x1d   :  { %v107_v39 = vmin.f32 %v59_v30, %v91_v31  ;;  %v136_v42 = vmax.f32 %v120_v32, 0.0  ;;  %v92_v44 = vmul.f32 5.0, %v76_v35  ;;  %v77_v45 = vsub.f32 0.8, %v29_v27  ;;  %v38_v31 = vld [vmem:[#allocation2 + $0x78] sm:$0xff]  ;;  %s173_s20 = sshll.u32 %s256_s0, 4  ;;  %s174_s20 = int_to_ptr.vmem [resolvable:$true] %s173_s20 }
  0x1e   :  { %v137_v43 = vmax.f32 %v121_v33, 0.0  ;;  %152 = vst.msk [vmem:[#allocation5] sm:$0xff] %vm151_vm0, %v135_v37  ;;  %v122_v46 = vmin.f32 %v106_v38, 1.0  ;;  %v61_v48 = vmul.f32 5.0, %v191_v40  ;;  %v192_v49 = vadd.f32 -0.2, %v30_v36  ;;  %p232_p9 = scmp.lt.s32.totalorder %s174_s20, %s174_s20 }
  0x1f   :  { %v123_v47 = vmin.f32 %v107_v39, 1.0  ;;  %153 = vst.msk [vmem:[#allocation5 + $0x8] sm:$0xff] %vm151_vm0, %v136_v42  ;;  %v108_v50 = vmin.f32 %v60_v34, %v92_v44  ;;  %v93_v51 = vmul.f32 5.0, %v77_v45  ;;  %v78_v52 = vsub.f32 0.8, %v30_v36  ;;  %s227_s21 = scalar_lea.vmem %s174_s20, 2048 }
  0x20   :  { %154 = vst.msk [vmem:[#allocation5 + $0x10] sm:$0xff] %vm151_vm0, %v137_v43  ;;  %v193_v53 = vadd.f32 -0.2, %v31_v41  ;;  %v138_v55 = vmax.f32 %v122_v46, 0.0  ;;  %v62_v57 = vmul.f32 5.0, %v192_v49  ;;  %p228_p8 = scmp.ne.s32.totalorder %s174_s20, %s227_s21  ;;  %p233_p10 = scmp.lt.s32.totalorder %s227_s21, %s227_s21 }
  0x21   :  { %v139_v56 = vmax.f32 %v123_v47, 0.0  ;;  %v79_v58 = vsub.f32 0.8, %v31_v41  ;;  %v124_v60 = vmin.f32 %v108_v50, 1.0  ;;  %v109_v61 = vmin.f32 %v61_v48, %v93_v51 }
  0x22   :  { %v94_v62 = vmul.f32 5.0, %v78_v52  ;;  %v63_v63 = vmul.f32 5.0, %v193_v53  ;;  %155 = vst.msk [vmem:[#allocation5 + $0x18] sm:$0xff] %vm151_vm0, %v138_v55  ;;  %v194_v1 = vadd.f32 -0.2, %v32_v54  ;;  %p234_p11 = por %p233_p10, %p232_p9 }
  0x23   :  { %156 = vst.msk [vmem:[#allocation5 + $0x20] sm:$0xff] %vm151_vm0, %v139_v56  ;;  %v95_v0 = vmul.f32 5.0, %v79_v58  ;;  %v80_v2 = vsub.f32 0.8, %v32_v54  ;;  %v140_v4 = vmax.f32 %v124_v60, 0.0  ;;  %v125_v5 = vmin.f32 %v109_v61, 1.0 }
  0x24   :  { %v110_v6 = vmin.f32 %v62_v57, %v94_v62  ;;  %v195_v7 = vadd.f32 -0.2, %v33_v59  ;;  %v64_v9 = vmul.f32 5.0, %v194_v1  ;;  %v81_v11 = vsub.f32 0.8, %v33_v59  ;;  %p235_p12 = pnand %p234_p11, %p228_p8 }
  0x25   :  { %v111_v8 = vmin.f32 %v63_v63, %v95_v0  ;;  %v96_v10 = vmul.f32 5.0, %v80_v2  ;;  %157 = vst.msk [vmem:[#allocation5 + $0x28] sm:$0xff] %vm151_vm0, %v140_v4  ;;  %v141_v13 = vmax.f32 %v125_v5, 0.0  ;;  %v196_v16 = vadd.f32 -0.2, %v34_v3 }
  0x26   :  { %v126_v14 = vmin.f32 %v110_v6, 1.0  ;;  %v65_v15 = vmul.f32 5.0, %v195_v7  ;;  %v97_v19 = vmul.f32 5.0, %v81_v11  ;;  %v82_v20 = vsub.f32 0.8, %v34_v3 }
  0x27   :  { %v127_v17 = vmin.f32 %v111_v8, 1.0  ;;  %v112_v18 = vmin.f32 %v64_v9, %v96_v10  ;;  %158 = vst.msk [vmem:[#allocation5 + $0x30] sm:$0xff] %vm151_vm0, %v141_v13  ;;  %v66_v24 = vmul.f32 5.0, %v196_v16  ;;  %v197_v25 = vadd.f32 -0.2, %v35_v12 }
  0x28   :  { %v142_v23 = vmax.f32 %v126_v14, 0.0  ;;  %v83_v26 = vsub.f32 0.8, %v35_v12  ;;  %v113_v29 = vmin.f32 %v65_v15, %v97_v19  ;;  %v98_v30 = vmul.f32 5.0, %v82_v20 }
  0x29   :  { %v143_v27 = vmax.f32 %v127_v17, 0.0  ;;  %v128_v28 = vmin.f32 %v112_v18, 1.0  ;;  %v67_v32 = vmul.f32 5.0, %v197_v25  ;;  %v198_v34 = vadd.f32 -0.2, %v36_v21 }
  0x2a   :  { %159 = vst.msk [vmem:[#allocation5 + $0x38] sm:$0xff] %vm151_vm0, %v142_v23  ;;  %v99_v33 = vmul.f32 5.0, %v83_v26  ;;  %v84_v35 = vsub.f32 0.8, %v36_v21  ;;  %v129_v37 = vmin.f32 %v113_v29, 1.0  ;;  %v114_v38 = vmin.f32 %v66_v24, %v98_v30 }
  0x2b   :  { %160 = vst.msk [vmem:[#allocation5 + $0x40] sm:$0xff] %vm151_vm0, %v143_v27  ;;  %v144_v36 = vmax.f32 %v128_v28, 0.0  ;;  %v199_v39 = vadd.f32 -0.2, %v37_v22  ;;  %v68_v41 = vmul.f32 5.0, %v198_v34 }
  0x2c   :  { %v115_v40 = vmin.f32 %v67_v32, %v99_v33  ;;  %v100_v42 = vmul.f32 5.0, %v84_v35  ;;  %v85_v43 = vsub.f32 0.8, %v37_v22  ;;  %v145_v44 = vmax.f32 %v129_v37, 0.0 }
  0x2d   :  { %161 = vst.msk [vmem:[#allocation5 + $0x48] sm:$0xff] %vm151_vm0, %v144_v36  ;;  %v130_v45 = vmin.f32 %v114_v38, 1.0  ;;  %v69_v46 = vmul.f32 5.0, %v199_v39  ;;  %v200_v47 = vadd.f32 -0.2, %v38_v31 }
  0x2e   :  { %v131_v48 = vmin.f32 %v115_v40, 1.0  ;;  %v116_v49 = vmin.f32 %v68_v41, %v100_v42  ;;  %v101_v50 = vmul.f32 5.0, %v85_v43  ;;  %v86_v51 = vsub.f32 0.8, %v38_v31  ;;  %162 = vst.msk [vmem:[#allocation5 + $0x50] sm:$0xff] %vm151_vm0, %v145_v44 }
  0x2f   :  { %v146_v52 = vmax.f32 %v130_v45, 0.0  ;;  %v70_v53 = vmul.f32 5.0, %v200_v47 }
  0x30   :  { %v147_v54 = vmax.f32 %v131_v48, 0.0  ;;  %v132_v55 = vmin.f32 %v116_v49, 1.0  ;;  %v117_v56 = vmin.f32 %v69_v46, %v101_v50  ;;  %v102_v57 = vmul.f32 5.0, %v86_v51 }
  0x31   :  { %163 = vst.msk [vmem:[#allocation5 + $0x58] sm:$0xff] %vm151_vm0, %v146_v52 }
  0x32   :  { %164 = vst.msk [vmem:[#allocation5 + $0x60] sm:$0xff] %vm151_vm0, %v147_v54  ;;  %v148_v58 = vmax.f32 %v132_v55, 0.0  ;;  %v133_v59 = vmin.f32 %v117_v56, 1.0  ;;  %v118_v60 = vmin.f32 %v70_v53, %v102_v57 }
  0x34   :  { %165 = vst.msk [vmem:[#allocation5 + $0x68] sm:$0xff] %vm151_vm0, %v148_v58  ;;  %v149_v61 = vmax.f32 %v133_v59, 0.0  ;;  %v134_v62 = vmin.f32 %v118_v60, 1.0 }
  0x36   :  { %166 = vst.msk [vmem:[#allocation5 + $0x70] sm:$0xff] %vm151_vm0, %v149_v61  ;;  %v150_v63 = vmax.f32 %v134_v62, 0.0 }
  0x38   :  { %167 = vst.msk [vmem:[#allocation5 + $0x78] sm:$0xff] %vm151_vm0, %v150_v63 }
  0x39   :  { %238 = shalt.err (!%p235_p12)
}
  0x3a   :  { %s239_s24 = scalar_lea.hbm %s314_s1, 2048 }
  0x3b   :  { %p240_p13 = scmp.ne.s32.totalorder %s314_s1, %s239_s24  ;;  %p243_p0 = scmp.lt.u32.totalorder %s239_s24, %s314_s1 }
  0x3d   :  { %p245_p1 = pnand %p243_p0, %p240_p13 }
  0x3f   :  { %248 = shalt.err (!%p245_p1)
}
  0x40   :  { %179 = dma.vmem_to_hbm [thread:$0]  %s174_s20, 2048, %s314_s1, [#allocation4], %s254_s16, %s254_s16, %s255_s17  }
  0x41   :  { %251 = dma.done.wait [#allocation4], 2048  }
  0x42   :  { %252 = vsyncadd [#allocation4], 4294965248 }
  0x43   :  { %183 = vsyncpa [#allocation3], 1 }
  0x44   :  { %184 = vsyncpa [#allocation4], 1 }

</bundles_post_ra>
